<compile_context>
chip_gen: v6e
topology: v6e:2x2x1
jax: 0.10.0
libtpu: 0.0.40
codegen_flags: <defaults>
</compile_context>

<pallas_src>
import functools

import numpy as np
import jax
import jax.numpy as jnp
from jax.experimental import pallas as pl
from jax.experimental.pallas import tpu as pltpu


# --------------------------------------------------------------------------------------
# Kernel
# --------------------------------------------------------------------------------------
def _diffusion_loss_kernel(x_ref, eps_ref, coef_ref, w_ref, psum_ref, *,
                           hw_valid, hw_tile, masked):
    x = x_ref[...]          # (rows, hw_tile)  f32
    eps = eps_ref[...]      # (rows, hw_tile)
    coef = coef_ref[...]    # (rows, 3): [sqrt(alpha_bar[t]), sqrt(1-alpha_bar[t]), temb[t]]

    sa = coef[:, 0:1]       # per-row q-sample coefficients (broadcast across lanes)
    om = coef[:, 1:2]
    bias = coef[:, 2:3]     # time-conditioned per-(example, channel) bias

    # q-sample
    xt = sa * x + om * eps

    # Synthetic noise-prediction model: block-diagonal 1x1 conv (single MXU matmul,
    # K = rows <= MXU height) + bias.
    pred = jnp.dot(w_ref[...], xt, preferred_element_type=jnp.float32) + bias

    # Squared error; per-lane partial sums (sublane-only reduce).  Cross-lane / cross-block
    # reduce and the mean happen outside the kernel.
    diff = pred - eps
    sq = diff * diff
    if masked:
        # Padded spatial lanes are NOT loss-neutral (pred = bias there) -> mask explicitly.
        j = pl.program_id(1)
        lane = jax.lax.broadcasted_iota(jnp.int32, (1, hw_tile), 1) + j * hw_tile
        sq = jnp.where(lane < hw_valid, sq, 0.0)

    psum_ref[...] = jnp.sum(sq, axis=0, keepdims=True)   # (1, hw_tile), lane-dense store


# --------------------------------------------------------------------------------------
# Tiling / chip heuristics
# --------------------------------------------------------------------------------------
def _chip_defaults():
    """(rows_cap, vmem_limit_bytes) per TPU generation."""
    try:
        kind = jax.devices()[0].device_kind.lower()
    except Exception:
        kind = ""
    if "v5" in kind:
        return 128, 96 << 20      # v5e: 128-wide MXU, 128 MiB physical VMEM
    if "v6" in kind:
        return 256, 96 << 20      # v6e: 256-wide MXU, 128 MiB physical VMEM
    if "7" in kind:
        return 256, 48 << 20      # v7x: 256-wide MXU, 64 MiB physical VMEM per TC
    return 256, 48 << 20          # unknown generation: conservative


def _choose_tiling(B, C, HW, rows_cap, vmem_limit_bytes):
    # --- batch block: largest divisor tb of B with tb*C <= rows_cap and (tb*C) % 8 == 0 ---
    tb = None
    for cand in range(B, 0, -1):
        if B % cand:
            continue
        if cand * C <= rows_cap and (cand * C) % 8 == 0:
            tb = cand
            break
    if tb is None:
        # Whole batch in one block: full-extent block is always layout-legal (just pads
        # sublanes if B*C is not a multiple of 8).
        tb = B
    rows = tb * C
    nblk = B // tb

    # --- spatial (lane) tiling: pad HW to a multiple of 128, pick a lane-dense tile ---
    HW_pad = ((HW + 127) // 128) * 128
    tile_budget = (vmem_limit_bytes * 2) // 3            # leave pipeline headroom
    lane_cap = tile_budget // (7 * rows * 4)              # ~7 tile-sized live buffers
    lane_cap = max(128, min(4096, (lane_cap // 128) * 128))
    hw_tile = 128
    d = 128
    while d <= min(HW_pad, lane_cap):
        if HW_pad % d == 0:
            hw_tile = d
        d += 128
    nhw = HW_pad // hw_tile

    # --- guarantee >= 2 parallel grid steps (v7x has 2 TensorCores per chip) ---
    if nblk * nhw < 2 and HW_pad >= 256:
        d = hw_tile - 128
        while d >= 128:
            if HW_pad % d == 0 and HW_pad // d >= 2:
                hw_tile, nhw = d, HW_pad // d
                break
            d -= 128

    return tb, rows, nblk, HW_pad, hw_tile, nhw


# --------------------------------------------------------------------------------------
# Factory: precompute tiling + block-diagonal weight once, return a jitted loss fn.
# --------------------------------------------------------------------------------------
def make_diffusion_loss_fn(B, C, H, W, w, *, rows_cap=None, vmem_limit_bytes=None):
    HW = H * W
    rows_cap_d, vmem_d = _chip_defaults()
    rows_cap = rows_cap_d if rows_cap is None else rows_cap
    vmem_limit_bytes = vmem_d if vmem_limit_bytes is None else vmem_limit_bytes

    tb, rows, nblk, HW_pad, hw_tile, nhw = _choose_tiling(B, C, HW, rows_cap, vmem_limit_bytes)
    masked = HW_pad != HW

    # Block-diagonal 1x1-conv weight (one (rows, rows) matmul mixes the channels of all tb
    # examples of a block at once).  Built ONCE here, reused across calls.
    w_blk = jnp.kron(jnp.eye(tb, dtype=jnp.float32), w.astype(jnp.float32))

    kernel = functools.partial(_diffusion_loss_kernel,
                               hw_valid=HW, hw_tile=hw_tile, masked=masked)

    grid_spec = pltpu.PrefetchScalarGridSpec(
        num_scalar_prefetch=0,
        grid=(nblk, nhw),
        in_specs=[
            pl.BlockSpec((rows, hw_tile), lambda i, j: (i, j)),   # x   (batch x spatial blocked)
            pl.BlockSpec((rows, hw_tile), lambda i, j: (i, j)),   # eps (batch x spatial blocked)
            pl.BlockSpec((rows, 3), lambda i, j: (i, 0)),         # [sa, om, bias] per row
            pl.BlockSpec((rows, rows), lambda i, j: (0, 0)),      # block-diag weight (resident)
        ],
        out_specs=pl.BlockSpec((None, None, 1, hw_tile), lambda i, j: (i, j, 0, 0)),
    )

    bytes_accessed = int((2 * B * C * HW_pad + nblk * nhw * hw_tile
                          + B * C * 3 + rows * rows) * 4)
    flops = int(2 * nblk * nhw * rows * rows * hw_tile + 8 * B * C * HW_pad)
    cost = pl.CostEstimate(flops=flops, transcendentals=0, bytes_accessed=bytes_accessed)

    call = pl.pallas_call(
        kernel,
        out_shape=jax.ShapeDtypeStruct((nblk, nhw, 1, hw_tile), jnp.float32),
        grid_spec=grid_spec,
        compiler_params=pltpu.CompilerParams(
            dimension_semantics=("parallel", "parallel"),   # independent blocks -> megacore
            vmem_limit_bytes=vmem_limit_bytes),
        cost_estimate=cost,
    )

    @jax.jit
    def loss_fn(x_nchw, t, eps_nchw, sqrt_alpha, one_minus_sqrt_alpha, temb):
        # Fold batch into the sublane (row) axis: row r = b*C + c.  Pure reshape.
        x2 = x_nchw.reshape(B * C, HW).astype(jnp.float32)
        eps2 = eps_nchw.reshape(B * C, HW).astype(jnp.float32)
        if masked:
            pad = HW_pad - HW
            x2 = jnp.pad(x2, ((0, 0), (0, pad)))
            eps2 = jnp.pad(eps2, ((0, 0), (0, pad)))

        # Wrapper-side timestep gathers (PyTorch extract()) merged into one (rows, 3) input.
        sa_rows = jnp.repeat(sqrt_alpha[t], C).reshape(B * C, 1)
        om_rows = jnp.repeat(one_minus_sqrt_alpha[t], C).reshape(B * C, 1)
        bias_rows = temb[t].reshape(B * C, 1)
        coef = jnp.concatenate([sa_rows, om_rows, bias_rows], axis=1).astype(jnp.float32)

        partials = call(x2, eps2, coef, w_blk)
        # Tiny final reduction + mean in XLA (denominator uses the true, unpadded size).
        return jnp.sum(partials) / jnp.float32(B * C * HW)

    return loss_fn


# --------------------------------------------------------------------------------------
# Pure-JAX reference (matches the PyTorch forward with the synthetic model).
# --------------------------------------------------------------------------------------
def reference_loss(x_nchw, t, eps_nchw, sqrt_alpha, one_minus_sqrt_alpha, w, temb):
    B, C, H, W = x_nchw.shape
    sa_t = sqrt_alpha[t][:, None, None, None]
    om_t = one_minus_sqrt_alpha[t][:, None, None, None]
    xt = sa_t * x_nchw + om_t * eps_nchw
    xt_f = xt.reshape(B, C, H * W)
    pred = jnp.einsum("oc,bcn->bon", w, xt_f) + temb[t][:, :, None]
    diff = pred - eps_nchw.reshape(B, C, H * W)
    return jnp.mean(diff * diff)


if __name__ == "__main__":
    # Diffusion schedule (matches the PyTorch __init__, computed in float64 then cast).
    beta1, betaT, T = 1e-4, 0.02, 100
    betas = np.linspace(beta1, betaT, T, dtype=np.float64)
    alphas = 1.0 - betas
    alpha_bar = np.cumprod(alphas)
    sqrt_alpha = jnp.asarray(np.sqrt(alpha_bar), dtype=jnp.float32)
    one_minus_sqrt_alpha = jnp.asarray(np.sqrt(1.0 - alpha_bar), dtype=jnp.float32)

    # Small shapes consistent with the forward pass.
    B, C, H, W = 2, 4, 16, 16

    key = jax.random.PRNGKey(0)
    kx, keps, kt, kw, kemb = jax.random.split(key, 5)

    x = jax.random.normal(kx, (B, C, H, W), dtype=jnp.float32)
    # TODO(synk): the module samples t and eps internally with torch RNG; sampled
    # deterministically here and fed in so the kernel computation is reproducible.
    eps = jax.random.normal(keps, (B, C, H, W), dtype=jnp.float32)
    t = jax.random.randint(kt, (B,), 0, T, dtype=jnp.int32)

    # Deterministic synthetic model parameters.
    w_conv = jax.random.normal(kw, (C, C), dtype=jnp.float32) * 0.1
    temb = jax.random.normal(kemb, (T, C), dtype=jnp.float32) * 0.1

    loss_fn = make_diffusion_loss_fn(B, C, H, W, w_conv)
    loss = jax.block_until_ready(
        loss_fn(x, t, eps, sqrt_alpha, one_minus_sqrt_alpha, temb))

    ref = jax.block_until_ready(
        reference_loss(x, t, eps, sqrt_alpha, one_minus_sqrt_alpha, w_conv, temb))

    if not np.allclose(np.asarray(loss), np.asarray(ref), rtol=1e-4, atol=1e-5):
        raise AssertionError(f"mismatch: pallas={loss} ref={ref}")

    print("KERNEL_OK")
</pallas_src>

<mosaic_0001>
module attributes {stable_mosaic.version = 11 : i64} {
  func.func @_diffusion_loss_kernel(%arg0: i32, %arg1: i32, %arg2: memref<8x128xf32, #tpu.memory_space<vmem>>, %arg3: memref<8x128xf32, #tpu.memory_space<vmem>>, %arg4: memref<8x3xf32, #tpu.memory_space<vmem>>, %arg5: memref<8x8xf32, #tpu.memory_space<vmem>>, %arg6: memref<1x1x1x128xf32, #tpu.memory_space<vmem>>) attributes {dimension_semantics = [#tpu.dimension_semantics<parallel>, #tpu.dimension_semantics<parallel>], iteration_bounds = array<i64: 1, 2>, scalar_prefetch = 0 : i64, scratch_operands = 0 : i64, tpu.core_type = #tpu.core_type<tc>, window_params = [{transform_indices = @transform_0, window_bounds = array<i64: 8, 128>}, {transform_indices = @transform_1, window_bounds = array<i64: 8, 128>}, {transform_indices = @transform_2, window_bounds = array<i64: 8, 3>}, {pipeline_mode = #tpu.pipeline_mode<synchronous>, transform_indices = @transform_3, window_bounds = array<i64: 8, 8>}, {transform_indices = @transform_4, window_bounds = array<i64: 1, 1, 1, 128>}]} {
    %c0 = arith.constant 0 : index
    %c0_0 = arith.constant 0 : index
    %0 = vector.load %arg2[%c0, %c0_0] : memref<8x128xf32, #tpu.memory_space<vmem>>, vector<8x128xf32>
    %c0_1 = arith.constant 0 : index
    %c0_2 = arith.constant 0 : index
    %1 = vector.load %arg3[%c0_1, %c0_2] : memref<8x128xf32, #tpu.memory_space<vmem>>, vector<8x128xf32>
    %c0_3 = arith.constant 0 : index
    %c0_4 = arith.constant 0 : index
    %2 = vector.load %arg4[%c0_3, %c0_4] : memref<8x3xf32, #tpu.memory_space<vmem>>, vector<8x3xf32>
    %3 = vector.extract_strided_slice %2 {offsets = [0, 0], sizes = [8, 1], strides = [1, 1]} : vector<8x3xf32> to vector<8x1xf32>
    %4 = vector.extract_strided_slice %2 {offsets = [0, 1], sizes = [8, 1], strides = [1, 1]} : vector<8x3xf32> to vector<8x1xf32>
    %5 = vector.extract_strided_slice %2 {offsets = [0, 2], sizes = [8, 1], strides = [1, 1]} : vector<8x3xf32> to vector<8x1xf32>
    %6 = vector.broadcast %3 : vector<8x1xf32> to vector<8x128xf32>
    %7 = arith.mulf %6, %0 : vector<8x128xf32>
    %8 = vector.broadcast %4 : vector<8x1xf32> to vector<8x128xf32>
    %9 = arith.mulf %8, %1 : vector<8x128xf32>
    %10 = arith.addf %7, %9 : vector<8x128xf32>
    %c0_5 = arith.constant 0 : index
    %c0_6 = arith.constant 0 : index
    %11 = vector.load %arg5[%c0_5, %c0_6] : memref<8x8xf32, #tpu.memory_space<vmem>>, vector<8x8xf32>
    %cst = arith.constant dense<0.000000e+00> : vector<8x128xf32>
    %12 = tpu.matmul %11, %10, %cst {dimension_numbers = #tpu.dot_dimension_numbers<[1], [0], [0], [1], [0, 0, 1, 1], [], []>} : vector<8x8xf32>, vector<8x128xf32>, vector<8x128xf32> -> vector<8x128xf32>
    %13 = vector.broadcast %5 : vector<8x1xf32> to vector<8x128xf32>
    %14 = arith.addf %12, %13 : vector<8x128xf32>
    %15 = arith.subf %14, %1 : vector<8x128xf32>
    %16 = arith.mulf %15, %15 : vector<8x128xf32>
    %cst_7 = arith.constant dense<0.000000e+00> : vector<128xf32>
    %17 = vector.multi_reduction <add>, %16, %cst_7 [0] : vector<8x128xf32> to vector<128xf32>
    %18 = vector.shape_cast %17 : vector<128xf32> to vector<1x128xf32>
    %c0_8 = arith.constant 0 : index
    %c0_9 = arith.constant 0 : index
    %c0_10 = arith.constant 0 : index
    %c0_11 = arith.constant 0 : index
    %19 = vector.load %arg6[%c0_8, %c0_9, %c0_10, %c0_11] : memref<1x1x1x128xf32, #tpu.memory_space<vmem>>, vector<1x1x1x128xf32>
    %20 = vector.shape_cast %19 : vector<1x1x1x128xf32> to vector<1x128xf32>
    %21 = vector.shape_cast %18 : vector<1x128xf32> to vector<1x1x1x128xf32>
    tpu.vector_store %arg6[%c0_8, %c0_9, %c0_10, %c0_11], %21 {strides = array<i32>} : memref<1x1x1x128xf32, #tpu.memory_space<vmem>>, vector<1x1x1x128xf32>,
    return
  }
  func.func @transform_0(%arg0: i32, %arg1: i32) -> (i32, i32) {
    %c0_i32 = arith.constant 0 : i32
    return %arg0, %arg1 : i32, i32
  }
  func.func @transform_1(%arg0: i32, %arg1: i32) -> (i32, i32) {
    %c0_i32 = arith.constant 0 : i32
    return %arg0, %arg1 : i32, i32
  }
  func.func @transform_2(%arg0: i32, %arg1: i32) -> (i32, i32) {
    %c0_i32 = arith.constant 0 : i32
    %c0_i32_0 = arith.constant 0 : i32
    return %arg0, %c0_i32 : i32, i32
  }
  func.func @transform_3(%arg0: i32, %arg1: i32) -> (i32, i32) {
    %c0_i32 = arith.constant 0 : i32
    %c0_i32_0 = arith.constant 0 : i32
    %c0_i32_1 = arith.constant 0 : i32
    return %c0_i32, %c0_i32_0 : i32, i32
  }
  func.func @transform_4(%arg0: i32, %arg1: i32) -> (i32, i32, i32, i32) {
    %c0_i32 = arith.constant 0 : i32
    %c0_i32_0 = arith.constant 0 : i32
    %c0_i32_1 = arith.constant 0 : i32
    return %arg0, %arg1, %c0_i32, %c0_i32_0 : i32, i32, i32, i32
  }
}

</mosaic_0001>

<bundles_post_ra>
// kernel: loss_fn.1
= control target key start
LH: loop header
LB: loop body
LE: loop exit
PB: predicated region body
PF: predicated region fallthrough
CT: control target
= control target key end

     0   :  { %s594_s15 = smov 0   ;;  %s596_s16 = smov 0   ;;  %s636_s0 = inlined_call_operand.vmem [shape: f32[8,256], index: 0, kind: input, shape index: {}]   ;;  %s637_s1 = inlined_call_operand.vmem [shape: f32[8,256], index: 1, kind: input, shape index: {}]   ;;  %s638_s2 = inlined_call_operand.vmem [shape: f32[8,3], index: 2, kind: input, shape index: {}]   ;;  %s639_s3 = inlined_call_operand.vmem [shape: f32[8,8], index: 3, kind: input, shape index: {}]   ;;  %s640_s4 = inlined_call_operand.vmem [shape: f32[1,2,1,128], index: 4, kind: output, shape index: {}]  }
   0x1   :  { %s598_s17 = smov 0  }
   0x2 LB: > { %s23_s18 = sadd.s32 1, %s558_s16  ;;  %p494_p0 = scmp.ge.s32.totalorder %s562_s17, 1  ;;  %s562_s17 = sphi %s598_s17, %s14_s17   ;;  %s558_s16 = sphi %s596_s16, %s642_s16   ;;  %s554_s15 = sphi %s594_s15, %s641_s15  }
   0x3   : > { %p24_p1 = scmp.ge.s32.totalorder %s23_s18, 2  ;;  %p205_p2 = scmp.lt.s32.totalorder %s562_s17, 3 }
   0x5   : > { %s644_s18 = smov (%p24_p1, %s23_s18), 0  ;;  %p206_p3 = pnand %p494_p0, %p205_p2 }
   0x6   : > { %p250_p4 = scmp.lt.s32.totalorder (!%p206_p3), %s554_s15, 1 }
   0x7   : > { %209 = sbr.rel (%p206_p3) target bundleno = 360 (0x168), region = 36 }
   0xc   : > { %v277_v0 = vld [vmem:[%s638_s2] sm:$0xff]  ;;  %v564_v1 = vmov 0   ;;  %v565_v2 = vmov 0.0   ;;  %v566_v3 = vmov 1   ;;  %vm567_vm0 = vmmov 0   ;;  %s646_s15 = smov (!%p250_p4, %s554_s15), 1 }
   0xd   : > { %536 = vset.pattern.permute.xlu0 %v564_v1  ;;  %502 = vmatprep.subr.mxu0 %v565_v2  ;;  %v568_v4 = vmov 2   ;;  %s495_s21 = sshll.u32 %s646_s15, 3  ;;  %v290_v12 = vld [vmem:[%s639_s3] sm:$0xff]  ;;  %vm295_vm1 = vcmask 64512   ;;  %s274_s6 = scalar_lea.vmem %s640_s4, %s646_s15 }
   0xe   : > { %280 = vperm.xlu0 %536, %v277_v0   ;;  %504 = vmatprep.mubr.msk.f32.mxu0 %vm567_vm0, %v565_v2  ;;  %s255_s24 = scalar_lea.vmem %s636_s0, %s495_s21  ;;  %s263_s27 = scalar_lea.vmem %s637_s1, %s495_s21 }
   0xf   : > { %538 = vset.pattern.permute.xlu1 %v568_v4  ;;  %v275_v6 = vld [vmem:[%s255_s24] sm:$0xff] }
  0x10   : > { %292 = vperm.xlu1 %538, %v277_v0   ;;  %v276_v7 = vld [vmem:[%s263_s27] sm:$0xff] }
  0x12   : > { %537 = vset.pattern.permute.xlu0 %v566_v3 }
  0x13   : > { %285 = vperm.xlu0 %537, %v277_v0  }
  0x17   : > { %539 = vset.pattern.permute.xlu0 %v568_v4 }
  0x89   : > { %v281_v5 = vpop.permute.xlu0 %280 }
  0x8a   : > { %v283_v9 = vmul.f32 %v281_v5, %v275_v6 }
  0x8b   : > { %v293_v13 = vpop.permute.xlu1 %292 }
  0x8e   : > { %v286_v8 = vpop.permute.xlu0 %285 }
  0x8f   : > { %v288_v10 = vmul.f32 %v286_v8, %v276_v7 }
  0x91   : > { %v289_v11 = vadd.f32 %v288_v10, %v283_v9 }
  0x93   : > { %503 = vmatpush3.msra.mxu0 %v289_v11 }
  0x94   : > { %505 = vmatmul.mubr.msk.f32.vlgmr.msra.gmra.mxu0 %vm295_vm1, %v290_v12 }
 0x154   : > { %v365_v14 = vpop.f32.mrf.mxu0 }
 0x155   : > { %v366_v15 = vadd.f32 %v365_v14, %v293_v13 }
 0x156   : > { %v506_v16 = vpop.f32.mrf.mxu0 }
 0x157   : > { %v369_v17 = vsub.f32 %v366_v15, %v276_v7 }
 0x159   : > { %v370_v18 = vmul.f32 %v369_v17, %v369_v17 }
 0x15b   : > { %v371_v19 = vrot.slane %v370_v18, 4 }
 0x15d   : > { %v372_v20 = vadd.f32 %v371_v19, %v370_v18 }
 0x15f   : > { %v373_v21 = vrot.slane %v372_v20, 2 }
 0x161   : > { %v374_v22 = vadd.f32 %v373_v21, %v372_v20 }
 0x163   : > { %v375_v23 = vrot.slane %v374_v22, 1 }
 0x165   : > { %v376_v24 = vadd.f32 %v375_v23, %v374_v22 }
 0x167   : > { %377 = vst [vmem:[%s274_s6] sm:$0x1] %v376_v24 }
 0x168 PF: > { %s14_s17 = sadd.s32 1, %s562_s17   ;;  %s641_s15 = smov %s558_s16 }
 0x169   : > { %p11_p5 = scmp.ge.s32.totalorder %s14_s17, 4   ;;  %s642_s16 = smov %s644_s18 }
 0x16b   :  { %13 = sbr.rel (!%p11_p5) target bundleno = 2 (0x2), region = 72 }

</bundles_post_ra>
